<compile_context>
chip_gen: v6e
topology: v6e:2x2x1
jax: 0.10.0
libtpu: 0.0.40
codegen_flags: <defaults>
</compile_context>

<pallas_src>
import math

import jax
import jax.numpy as jnp
import numpy as np
from jax.experimental import pallas as pl
from jax.experimental.pallas import tpu as pltpu

_LOG_SQRT_2PI = 0.5 * math.log(2.0 * math.pi)


def _round_up(x, m):
    return ((x + m - 1) // m) * m


def actor_kernel(state_ref, eps_ref,
                 w1_ref, b1_ref, w2_ref, b2_ref, w3_ref, b3_ref,
                 wh_ref, bh_ref,
                 out_ref):
    """One batch tile of the Actor forward.

    out_ref is a lane-dense (TB, OUT >= 128) f32 slab:
      lanes [0, A)  -> action  = tanh(mean + std * eps)
      lanes [A, 2A) -> tanh(mean)
      lane  2A      -> sum_j log_prob_j
    """
    A = eps_ref.shape[-1]

    # MLP trunk: bf16 operands on the MXU, f32 accumulation, f32 elementwise.
    x = state_ref[...]
    if x.dtype != jnp.bfloat16:
        x = x.astype(jnp.bfloat16)
    h1 = jnp.maximum(
        jnp.dot(x, w1_ref[...], preferred_element_type=jnp.float32)
        + b1_ref[...], 0.0)
    h2 = jnp.maximum(
        jnp.dot(h1.astype(jnp.bfloat16), w2_ref[...],
                preferred_element_type=jnp.float32) + b2_ref[...], 0.0)
    h3 = jnp.maximum(
        jnp.dot(h2.astype(jnp.bfloat16), w3_ref[...],
                preferred_element_type=jnp.float32) + b3_ref[...], 0.0)

    # Fused mean / log_std head: one (256, 2A) matmul, then in-vreg lane slices
    # (2A lanes live in a single vreg, so the slices are cheap selects).
    head = jnp.dot(h3.astype(jnp.bfloat16), wh_ref[...],
                   preferred_element_type=jnp.float32) + bh_ref[...]
    mean = head[:, :A]
    log_std = jnp.clip(head[:, A:], -20.0, 2.0)
    std = jnp.exp(log_std)

    # Reparameterized sample + tanh squash (eps drawn outside the kernel).
    eps = eps_ref[...]
    x_t = mean + std * eps
    y_t = jnp.tanh(x_t)
    tanh_mean = jnp.tanh(mean)

    # Normal(mean, std).log_prob(x_t); note (x_t - mean) / std == eps exactly.
    log_prob = -0.5 * eps * eps - log_std - _LOG_SQRT_2PI
    # TODO(synk): the stable form 2*(ln2 - x_t - softplus(-2*x_t)) avoids the
    # 1e-6 fudge; kept as-is for exact parity with the torch reference.
    log_prob = log_prob - jnp.log(1.0 - y_t * y_t + 1e-6)
    logp = jnp.sum(log_prob, axis=1, keepdims=True)

    # Packed lane-dense output: zero the slab once, then drop the three
    # results into their lane ranges.  The HBM writeback is one unmasked
    # 128-lane DMA per tile.
    out_ref[...] = jnp.zeros_like(out_ref)
    out_ref[:, 0:A] = y_t
    out_ref[:, A:2 * A] = tanh_mean
    out_ref[:, 2 * A:2 * A + 1] = logp


def _pick_batch_tile(B8, block_b):
    """Choose the batch tile TB (multiple of 8) for an 8-aligned batch B8."""
    TB = min(block_b, B8)
    # Large batch that fits in a single tile -> split so a 2nd TensorCore
    # (v7x) gets grid work; small batches keep one step (pure overhead else).
    if B8 > 512 and B8 <= TB:
        TB = _round_up(-(-B8 // 2), 8)
    # Big-batch regime: prefer a tile that divides B8 exactly so the
    # batch-scaled inputs need no extra HBM padding pass (but keep the grid
    # from exploding: only accept a divisor >= TB/4).
    if B8 % TB != 0 and B8 > 4 * TB:
        cand = TB
        while cand >= 8 and B8 % cand != 0:
            cand -= 8
        if cand >= 8 and cand * 4 >= TB:
            TB = cand
    return TB


def actor_forward(state, eps, params, *, block_b=1024):
    """state: (B, S) f32/bf16, eps: (B, A) f32 standard-normal noise.

    `params` must come from prepare_actor_params() (fused head pre-built).
    Returns (action (B, A), log_prob (B,), tanh(mean) (B, A)) matching the
    torch Actor.forward semantics.
    """
    B, S = state.shape
    A = eps.shape[1]
    wh, bh = params["wh"], params["bh"]

    # Packed output lane width: >= 128 and wide enough for action|tanh|logp.
    OUT = _round_up(max(2 * A + 1, 128), 128)

    B8 = _round_up(B, 8)
    TB = _pick_batch_tile(B8, block_b)
    B_pad = _round_up(B8, TB)
    if B_pad != B:
        pad = B_pad - B
        state = jnp.pad(state, ((0, pad), (0, 0)))
        eps = jnp.pad(eps, ((0, pad), (0, 0)))

    grid = (B_pad // TB,)

    def tile_spec(last):
        return pl.BlockSpec((TB, last), lambda i: (i, 0))

    def resident(arr):
        # Full-array block, constant index -> loaded once, stays in VMEM.
        return pl.BlockSpec(arr.shape, lambda i: (0, 0))

    weights = (params["w1"], params["b1"], params["w2"], params["b2"],
               params["w3"], params["b3"], wh, bh)
    weight_bytes = sum(int(np.prod(w.shape)) * w.dtype.itemsize
                       for w in weights)
    flops = 2 * B_pad * (S * 512 + 512 * 256 + 256 * 256 + 256 * 2 * A)
    cost = pl.CostEstimate(
        flops=flops,
        transcendentals=4 * B_pad * A,                    # exp, 2x tanh, log
        bytes_accessed=(weight_bytes
                        + B_pad * (S * state.dtype.itemsize
                                   + A * 4 + OUT * 4)))

    packed = pl.pallas_call(
        actor_kernel,
        out_shape=jax.ShapeDtypeStruct((B_pad, OUT), jnp.float32),
        grid=grid,
        in_specs=[
            tile_spec(S),                                 # state tile
            tile_spec(A),                                 # eps tile
            resident(params["w1"]), resident(params["b1"]),
            resident(params["w2"]), resident(params["b2"]),
            resident(params["w3"]), resident(params["b3"]),
            resident(wh), resident(bh),
        ],
        out_specs=pl.BlockSpec((TB, OUT), lambda i: (i, 0)),
        compiler_params=pltpu.CompilerParams(
            # TODO(synk): on v7x, pltpu.CORE_PARALLEL on this axis would force
            # the grid split across both TensorCores; "parallel" kept for
            # portability across v5e/v6e.
            dimension_semantics=("parallel",),
            vmem_limit_bytes=32 * 1024 * 1024),
        cost_estimate=cost,
    )(state, eps,
      params["w1"], params["b1"],
      params["w2"], params["b2"],
      params["w3"], params["b3"],
      wh, bh)

    action = packed[:B, :A]
    tanh_mean = packed[:B, A:2 * A]
    log_prob = packed[:B, 2 * A]
    return action, log_prob, tanh_mean


def init_linear(key, fan_in, fan_out, weight_dtype=jnp.bfloat16):
    # PyTorch nn.Linear default init: U(-1/sqrt(fan_in), 1/sqrt(fan_in)).
    kw, kb = jax.random.split(key)
    bound = 1.0 / math.sqrt(fan_in)
    w = jax.random.uniform(kw, (fan_in, fan_out), jnp.float32, -bound, bound)
    b = jax.random.uniform(kb, (1, fan_out), jnp.float32, -bound, bound)
    return w.astype(weight_dtype), b        # weights bf16 (MXU), biases f32


def init_actor_params(key, state_shape, num_actions,
                      weight_dtype=jnp.bfloat16):
    keys = jax.random.split(key, 5)
    w1, b1 = init_linear(keys[0], state_shape, 512, weight_dtype)
    w2, b2 = init_linear(keys[1], 512, 256, weight_dtype)
    w3, b3 = init_linear(keys[2], 256, 256, weight_dtype)
    wm, bm = init_linear(keys[3], 256, num_actions, weight_dtype)
    ws, bs = init_linear(keys[4], 256, num_actions, weight_dtype)
    return dict(w1=w1, b1=b1, w2=w2, b2=b2, w3=w3, b3=b3,
                wm=wm, bm=bm, ws=ws, bs=bs)


def prepare_actor_params(params):
    """One-time parameter prep (call once, NOT per forward): fuses the
    mean / log_std heads into a single (256, 2A) weight / (1, 2A) bias so no
    per-call concat sits on the critical path."""
    prepped = dict(params)
    prepped["wh"] = jnp.concatenate([params["wm"], params["ws"]], axis=1)
    prepped["bh"] = jnp.concatenate([params["bm"], params["bs"]], axis=1)
    return prepped


def actor_reference(state, eps, params):
    """Pure-JAX f32 reference (same bf16 weights, upcast)."""
    def lin(x, w, b):
        return jnp.dot(x, w.astype(jnp.float32)) + b
    h = jax.nn.relu(lin(state, params["w1"], params["b1"]))
    h = jax.nn.relu(lin(h, params["w2"], params["b2"]))
    h = jax.nn.relu(lin(h, params["w3"], params["b3"]))
    mean = lin(h, params["wm"], params["bm"])
    log_std = jnp.clip(lin(h, params["ws"], params["bs"]), -20.0, 2.0)
    std = jnp.exp(log_std)
    x_t = mean + std * eps
    y_t = jnp.tanh(x_t)
    log_prob = (-0.5 * eps * eps - log_std - _LOG_SQRT_2PI
                - jnp.log(1.0 - y_t * y_t + 1e-6))
    return y_t, jnp.sum(log_prob, axis=1), jnp.tanh(mean)


if __name__ == "__main__":
    key = jax.random.PRNGKey(0)
    k_params, k_state, k_eps = jax.random.split(key, 3)

    batch = 2
    state_shape = 16
    num_actions = 8

    params = prepare_actor_params(
        init_actor_params(k_params, state_shape, num_actions))
    # State streamed in bf16 (replay-buffer dtype); eps is f32 N(0,1) noise
    # supplied externally to reproduce Normal.rsample().
    state = jax.random.normal(
        k_state, (batch, state_shape), jnp.float32).astype(jnp.bfloat16)
    eps = jax.random.normal(k_eps, (batch, num_actions), jnp.float32)

    action, log_prob, tanh_mean = actor_forward(state, eps, params)
    jax.block_until_ready((action, log_prob, tanh_mean))

    assert action.shape == (batch, num_actions)
    assert log_prob.shape == (batch,)
    assert tanh_mean.shape == (batch, num_actions)
    assert bool(jnp.all(jnp.isfinite(action)))
    assert bool(jnp.all(jnp.isfinite(log_prob)))
    assert bool(jnp.all(jnp.isfinite(tanh_mean)))

    # Loose-tolerance check vs the pure-JAX reference (bf16 MXU vs f32).
    ref_a, ref_lp, ref_tm = actor_reference(
        state.astype(jnp.float32), eps, params)
    np.testing.assert_allclose(np.asarray(action), np.asarray(ref_a),
                               atol=5e-2)
    np.testing.assert_allclose(np.asarray(tanh_mean), np.asarray(ref_tm),
                               atol=5e-2)
    np.testing.assert_allclose(np.asarray(log_prob), np.asarray(ref_lp),
                               atol=5e-1)

    print("KERNEL_OK")
</pallas_src>

<mosaic_0001>
module attributes {stable_mosaic.version = 11 : i64} {
  func.func @actor_kernel(%arg0: i32, %arg1: memref<8x16xbf16, #tpu.memory_space<vmem>>, %arg2: memref<8x8xf32, #tpu.memory_space<vmem>>, %arg3: memref<16x512xbf16, #tpu.memory_space<vmem>>, %arg4: memref<1x512xf32, #tpu.memory_space<vmem>>, %arg5: memref<512x256xbf16, #tpu.memory_space<vmem>>, %arg6: memref<1x256xf32, #tpu.memory_space<vmem>>, %arg7: memref<256x256xbf16, #tpu.memory_space<vmem>>, %arg8: memref<1x256xf32, #tpu.memory_space<vmem>>, %arg9: memref<256x16xbf16, #tpu.memory_space<vmem>>, %arg10: memref<1x16xf32, #tpu.memory_space<vmem>>, %arg11: memref<8x128xf32, #tpu.memory_space<vmem>>) attributes {dimension_semantics = [#tpu.dimension_semantics<parallel>], iteration_bounds = array<i64: 1>, scalar_prefetch = 0 : i64, scratch_operands = 0 : i64, tpu.core_type = #tpu.core_type<tc>, window_params = [{transform_indices = @transform_0, window_bounds = array<i64: 8, 16>}, {transform_indices = @transform_1, window_bounds = array<i64: 8, 8>}, {pipeline_mode = #tpu.pipeline_mode<synchronous>, transform_indices = @transform_2, window_bounds = array<i64: 16, 512>}, {pipeline_mode = #tpu.pipeline_mode<synchronous>, transform_indices = @transform_3, window_bounds = array<i64: 1, 512>}, {pipeline_mode = #tpu.pipeline_mode<synchronous>, transform_indices = @transform_4, window_bounds = array<i64: 512, 256>}, {pipeline_mode = #tpu.pipeline_mode<synchronous>, transform_indices = @transform_5, window_bounds = array<i64: 1, 256>}, {pipeline_mode = #tpu.pipeline_mode<synchronous>, transform_indices = @transform_6, window_bounds = array<i64: 256, 256>}, {pipeline_mode = #tpu.pipeline_mode<synchronous>, transform_indices = @transform_7, window_bounds = array<i64: 1, 256>}, {pipeline_mode = #tpu.pipeline_mode<synchronous>, transform_indices = @transform_8, window_bounds = array<i64: 256, 16>}, {pipeline_mode = #tpu.pipeline_mode<synchronous>, transform_indices = @transform_9, window_bounds = array<i64: 1, 16>}, {transform_indices = @transform_10, window_bounds = array<i64: 8, 128>}]} {
    %c0 = arith.constant 0 : index
    %c0_0 = arith.constant 0 : index
    %0 = vector.load %arg1[%c0, %c0_0] : memref<8x16xbf16, #tpu.memory_space<vmem>>, vector<8x16xbf16>
    %c0_1 = arith.constant 0 : index
    %c0_2 = arith.constant 0 : index
    %1 = vector.load %arg3[%c0_1, %c0_2] : memref<16x512xbf16, #tpu.memory_space<vmem>>, vector<16x512xbf16>
    %cst = arith.constant dense<0.000000e+00> : vector<8x512xf32>
    %2 = tpu.matmul %0, %1, %cst {dimension_numbers = #tpu.dot_dimension_numbers<[1], [0], [0], [1], [0, 0, 1, 1], [], []>} : vector<8x16xbf16>, vector<16x512xbf16>, vector<8x512xf32> -> vector<8x512xf32>
    %c0_3 = arith.constant 0 : index
    %c0_4 = arith.constant 0 : index
    %3 = vector.load %arg4[%c0_3, %c0_4] : memref<1x512xf32, #tpu.memory_space<vmem>>, vector<1x512xf32>
    %4 = vector.broadcast %3 : vector<1x512xf32> to vector<8x512xf32>
    %5 = arith.addf %2, %4 : vector<8x512xf32>
    %cst_5 = arith.constant 0.000000e+00 : f32
    %6 = vector.broadcast %cst_5 : f32 to vector<8x512xf32>
    %7 = arith.maximumf %5, %6 : vector<8x512xf32>
    %8 = arith.truncf %7 : vector<8x512xf32> to vector<8x512xbf16>
    %c0_6 = arith.constant 0 : index
    %c0_7 = arith.constant 0 : index
    %9 = vector.load %arg5[%c0_6, %c0_7] : memref<512x256xbf16, #tpu.memory_space<vmem>>, vector<512x256xbf16>
    %cst_8 = arith.constant dense<0.000000e+00> : vector<8x256xf32>
    %10 = tpu.matmul %8, %9, %cst_8 {dimension_numbers = #tpu.dot_dimension_numbers<[1], [0], [0], [1], [0, 0, 1, 1], [], []>} : vector<8x512xbf16>, vector<512x256xbf16>, vector<8x256xf32> -> vector<8x256xf32>
    %c0_9 = arith.constant 0 : index
    %c0_10 = arith.constant 0 : index
    %11 = vector.load %arg6[%c0_9, %c0_10] : memref<1x256xf32, #tpu.memory_space<vmem>>, vector<1x256xf32>
    %12 = vector.broadcast %11 : vector<1x256xf32> to vector<8x256xf32>
    %13 = arith.addf %10, %12 : vector<8x256xf32>
    %cst_11 = arith.constant 0.000000e+00 : f32
    %14 = vector.broadcast %cst_11 : f32 to vector<8x256xf32>
    %15 = arith.maximumf %13, %14 : vector<8x256xf32>
    %16 = arith.truncf %15 : vector<8x256xf32> to vector<8x256xbf16>
    %c0_12 = arith.constant 0 : index
    %c0_13 = arith.constant 0 : index
    %17 = vector.load %arg7[%c0_12, %c0_13] : memref<256x256xbf16, #tpu.memory_space<vmem>>, vector<256x256xbf16>
    %cst_14 = arith.constant dense<0.000000e+00> : vector<8x256xf32>
    %18 = tpu.matmul %16, %17, %cst_14 {dimension_numbers = #tpu.dot_dimension_numbers<[1], [0], [0], [1], [0, 0, 1, 1], [], []>} : vector<8x256xbf16>, vector<256x256xbf16>, vector<8x256xf32> -> vector<8x256xf32>
    %c0_15 = arith.constant 0 : index
    %c0_16 = arith.constant 0 : index
    %19 = vector.load %arg8[%c0_15, %c0_16] : memref<1x256xf32, #tpu.memory_space<vmem>>, vector<1x256xf32>
    %20 = vector.broadcast %19 : vector<1x256xf32> to vector<8x256xf32>
    %21 = arith.addf %18, %20 : vector<8x256xf32>
    %cst_17 = arith.constant 0.000000e+00 : f32
    %22 = vector.broadcast %cst_17 : f32 to vector<8x256xf32>
    %23 = arith.maximumf %21, %22 : vector<8x256xf32>
    %24 = arith.truncf %23 : vector<8x256xf32> to vector<8x256xbf16>
    %c0_18 = arith.constant 0 : index
    %c0_19 = arith.constant 0 : index
    %25 = vector.load %arg9[%c0_18, %c0_19] : memref<256x16xbf16, #tpu.memory_space<vmem>>, vector<256x16xbf16>
    %cst_20 = arith.constant dense<0.000000e+00> : vector<8x16xf32>
    %26 = tpu.matmul %24, %25, %cst_20 {dimension_numbers = #tpu.dot_dimension_numbers<[1], [0], [0], [1], [0, 0, 1, 1], [], []>} : vector<8x256xbf16>, vector<256x16xbf16>, vector<8x16xf32> -> vector<8x16xf32>
    %c0_21 = arith.constant 0 : index
    %c0_22 = arith.constant 0 : index
    %27 = vector.load %arg10[%c0_21, %c0_22] : memref<1x16xf32, #tpu.memory_space<vmem>>, vector<1x16xf32>
    %28 = vector.broadcast %27 : vector<1x16xf32> to vector<8x16xf32>
    %29 = arith.addf %26, %28 : vector<8x16xf32>
    %30 = vector.extract_strided_slice %29 {offsets = [0, 0], sizes = [8, 8], strides = [1, 1]} : vector<8x16xf32> to vector<8x8xf32>
    %31 = vector.extract_strided_slice %29 {offsets = [0, 8], sizes = [8, 8], strides = [1, 1]} : vector<8x16xf32> to vector<8x8xf32>
    %cst_23 = arith.constant -2.000000e+01 : f32
    %cst_24 = arith.constant 2.000000e+00 : f32
    %32 = vector.broadcast %cst_23 : f32 to vector<8x8xf32>
    %33 = arith.maximumf %32, %31 : vector<8x8xf32>
    %34 = vector.broadcast %cst_24 : f32 to vector<8x8xf32>
    %35 = arith.minimumf %34, %33 : vector<8x8xf32>
    %36 = math.exp %35 : vector<8x8xf32>
    %c0_25 = arith.constant 0 : index
    %c0_26 = arith.constant 0 : index
    %37 = vector.load %arg2[%c0_25, %c0_26] : memref<8x8xf32, #tpu.memory_space<vmem>>, vector<8x8xf32>
    %38 = arith.mulf %36, %37 : vector<8x8xf32>
    %39 = arith.addf %30, %38 : vector<8x8xf32>
    %40 = math.tanh %39 : vector<8x8xf32>
    %41 = math.tanh %30 : vector<8x8xf32>
    %cst_27 = arith.constant -5.000000e-01 : f32
    %42 = vector.broadcast %cst_27 : f32 to vector<8x8xf32>
    %43 = arith.mulf %42, %37 : vector<8x8xf32>
    %44 = arith.mulf %43, %37 : vector<8x8xf32>
    %45 = arith.subf %44, %35 : vector<8x8xf32>
    %cst_28 = arith.constant 0.918938517 : f32
    %46 = vector.broadcast %cst_28 : f32 to vector<8x8xf32>
    %47 = arith.subf %45, %46 : vector<8x8xf32>
    %48 = arith.mulf %40, %40 : vector<8x8xf32>
    %cst_29 = arith.constant 1.000000e+00 : f32
    %49 = vector.broadcast %cst_29 : f32 to vector<8x8xf32>
    %50 = arith.subf %49, %48 : vector<8x8xf32>
    %cst_30 = arith.constant 9.99999997E-7 : f32
    %51 = vector.broadcast %cst_30 : f32 to vector<8x8xf32>
    %52 = arith.addf %50, %51 : vector<8x8xf32>
    %53 = math.log %52 : vector<8x8xf32>
    %54 = arith.subf %47, %53 : vector<8x8xf32>
    %cst_31 = arith.constant dense<0.000000e+00> : vector<8xf32>
    %55 = vector.multi_reduction <add>, %54, %cst_31 [1] : vector<8x8xf32> to vector<8xf32>
    %56 = vector.shape_cast %55 : vector<8xf32> to vector<8x1xf32>
    %cst_32 = arith.constant 0.000000e+00 : f32
    %57 = vector.broadcast %cst_32 : f32 to vector<8x128xf32>
    %c0_33 = arith.constant 0 : index
    %c0_34 = arith.constant 0 : index
    %58 = vector.load %arg11[%c0_33, %c0_34] : memref<8x128xf32, #tpu.memory_space<vmem>>, vector<8x128xf32>
    tpu.vector_store %arg11[%c0_33, %c0_34], %57 {strides = array<i32>} : memref<8x128xf32, #tpu.memory_space<vmem>>, vector<8x128xf32>,
    %c0_35 = arith.constant 0 : index
    %c0_36 = arith.constant 0 : index
    %59 = vector.load %arg11[%c0_35, %c0_36] : memref<8x128xf32, #tpu.memory_space<vmem>>, vector<8x8xf32>
    tpu.vector_store %arg11[%c0_35, %c0_36], %40 {strides = array<i32>} : memref<8x128xf32, #tpu.memory_space<vmem>>, vector<8x8xf32>,
    %c0_37 = arith.constant 0 : index
    %c8 = arith.constant 8 : index
    %60 = vector.load %arg11[%c0_37, %c8] : memref<8x128xf32, #tpu.memory_space<vmem>>, vector<8x8xf32>
    tpu.vector_store %arg11[%c0_37, %c8], %41 {strides = array<i32>} : memref<8x128xf32, #tpu.memory_space<vmem>>, vector<8x8xf32>,
    %c0_38 = arith.constant 0 : index
    %c16 = arith.constant 16 : index
    %61 = vector.load %arg11[%c0_38, %c16] : memref<8x128xf32, #tpu.memory_space<vmem>>, vector<8x1xf32>
    tpu.vector_store %arg11[%c0_38, %c16], %56 {strides = array<i32>} : memref<8x128xf32, #tpu.memory_space<vmem>>, vector<8x1xf32>,
    return
  }
  func.func @transform_0(%arg0: i32) -> (i32, i32) {
    %c0_i32 = arith.constant 0 : i32
    %c0_i32_0 = arith.constant 0 : i32
    return %arg0, %c0_i32 : i32, i32
  }
  func.func @transform_1(%arg0: i32) -> (i32, i32) {
    %c0_i32 = arith.constant 0 : i32
    %c0_i32_0 = arith.constant 0 : i32
    return %arg0, %c0_i32 : i32, i32
  }
  func.func @transform_2(%arg0: i32) -> (i32, i32) {
    %c0_i32 = arith.constant 0 : i32
    %c0_i32_0 = arith.constant 0 : i32
    %c0_i32_1 = arith.constant 0 : i32
    return %c0_i32, %c0_i32_0 : i32, i32
  }
  func.func @transform_3(%arg0: i32) -> (i32, i32) {
    %c0_i32 = arith.constant 0 : i32
    %c0_i32_0 = arith.constant 0 : i32
    %c0_i32_1 = arith.constant 0 : i32
    return %c0_i32, %c0_i32_0 : i32, i32
  }
  func.func @transform_4(%arg0: i32) -> (i32, i32) {
    %c0_i32 = arith.constant 0 : i32
    %c0_i32_0 = arith.constant 0 : i32
    %c0_i32_1 = arith.constant 0 : i32
    return %c0_i32, %c0_i32_0 : i32, i32
  }
  func.func @transform_5(%arg0: i32) -> (i32, i32) {
    %c0_i32 = arith.constant 0 : i32
    %c0_i32_0 = arith.constant 0 : i32
    %c0_i32_1 = arith.constant 0 : i32
    return %c0_i32, %c0_i32_0 : i32, i32
  }
  func.func @transform_6(%arg0: i32) -> (i32, i32) {
    %c0_i32 = arith.constant 0 : i32
    %c0_i32_0 = arith.constant 0 : i32
    %c0_i32_1 = arith.constant 0 : i32
    return %c0_i32, %c0_i32_0 : i32, i32
  }
  func.func @transform_7(%arg0: i32) -> (i32, i32) {
    %c0_i32 = arith.constant 0 : i32
    %c0_i32_0 = arith.constant 0 : i32
    %c0_i32_1 = arith.constant 0 : i32
    return %c0_i32, %c0_i32_0 : i32, i32
  }
  func.func @transform_8(%arg0: i32) -> (i32, i32) {
    %c0_i32 = arith.constant 0 : i32
    %c0_i32_0 = arith.constant 0 : i32
    %c0_i32_1 = arith.constant 0 : i32
    return %c0_i32, %c0_i32_0 : i32, i32
  }
  func.func @transform_9(%arg0: i32) -> (i32, i32) {
    %c0_i32 = arith.constant 0 : i32
    %c0_i32_0 = arith.constant 0 : i32
    %c0_i32_1 = arith.constant 0 : i32
    return %c0_i32, %c0_i32_0 : i32, i32
  }
  func.func @transform_10(%arg0: i32) -> (i32, i32) {
    %c0_i32 = arith.constant 0 : i32
    %c0_i32_0 = arith.constant 0 : i32
    return %arg0, %c0_i32 : i32, i32
  }
}

</mosaic_0001>

<bundles_post_ra>
// kernel: tpu_custom_call.1
= control target key start
LH: loop header
LB: loop body
LE: loop exit
PB: predicated region body
PF: predicated region fallthrough
CT: control target
= control target key end

     0   :  { %15 = vsyncpa [#allocation3], 0  ;;  %s1731_s0 = inlined_call_operand.vmem [shape: bf16[8,16], index: 0, kind: input, shape index: {}]   ;;  %s1732_s1 = inlined_call_operand.vmem [shape: f32[8,8], index: 1, kind: input, shape index: {}]   ;;  %s1733_s2 = inlined_call_operand.vmem [shape: bf16[16,512], index: 2, kind: input, shape index: {}]   ;;  %s1734_s3 = inlined_call_operand.vmem [shape: f32[1,512], index: 3, kind: input, shape index: {}]   ;;  %s1735_s4 = inlined_call_operand.hbm [shape: bf16[512,256], index: 4, kind: input, shape index: {}]   ;;  %s1736_s5 = inlined_call_operand.vmem [shape: f32[1,256], index: 5, kind: input, shape index: {}]   ;;  %s1737_s6 = inlined_call_operand.hbm [shape: bf16[256,256], index: 6, kind: input, shape index: {}]   ;;  %s1738_s7 = inlined_call_operand.vmem [shape: f32[1,256], index: 7, kind: input, shape index: {}]   ;;  %s1739_s8 = inlined_call_operand.vmem [shape: bf16[256,16], index: 8, kind: input, shape index: {}]   ;;  %s1740_s9 = inlined_call_operand.vmem [shape: f32[1,16], index: 9, kind: input, shape index: {}]   ;;  %s1741_s10 = inlined_call_operand.hbm [shape: f32[8,128], index: 10, kind: output, shape index: {}]  }
   0x1   :  { %16 = vsyncpa [#allocation6], 0 }
   0x2   :  { %17 = vsyncpa [#allocation4], 0  ;;  %s1563_s13 = smov [#allocation2]  }
   0x3   :  { %s31_s14 = sshll.u32 %s1563_s13, 4  ;;  %s32_s14 = int_to_ptr.vmem [resolvable:$true] %s31_s14 }
   0x4   :  { %s1505_s15 = scalar_lea.vmem %s32_s14, 8192  ;;  %p1510_p1 = scmp.lt.s32.totalorder %s32_s14, %s32_s14 }
   0x5   :  { %p1506_p0 = scmp.ne.s32.totalorder %s32_s14, %s1505_s15  ;;  %p1511_p2 = scmp.lt.s32.totalorder %s1505_s15, %s1505_s15 }
   0x7   :  { %p1512_p3 = por %p1511_p2, %p1510_p1 }
   0x9   :  { %p1513_p4 = pnand %p1512_p3, %p1506_p0 }
   0xb   :  { %1516 = shalt.err (!%p1513_p4)
}
   0xc   :  { %s1564_s16 = smov 128   ;;  %s1565_s17 = smov 8  }
   0xd   :  { %37 = dma.hbm_to_vmem [thread:$0]  %s1735_s4, 8192, %s32_s14, [#allocation3], %s1564_s16, %s1564_s16, %s1565_s17  }
   0xe   :  { %s1566_s20 = smov [#allocation5]  }
   0xf   :  { %s45_s21 = sshll.u32 %s1566_s20, 4  ;;  %s46_s21 = int_to_ptr.vmem [resolvable:$true] %s45_s21 }
  0x10   :  { %s1525_s22 = scalar_lea.vmem %s46_s21, 4096  ;;  %p1530_p6 = scmp.lt.s32.totalorder %s46_s21, %s46_s21 }
  0x11   :  { %p1526_p5 = scmp.ne.s32.totalorder %s46_s21, %s1525_s22  ;;  %p1531_p7 = scmp.lt.s32.totalorder %s1525_s22, %s1525_s22 }
  0x13   :  { %p1532_p8 = por %p1531_p7, %p1530_p6 }
  0x15   :  { %p1533_p9 = pnand %p1532_p8, %p1526_p5 }
  0x17   :  { %1536 = shalt.err (!%p1533_p9)
}
  0x18   :  { %51 = dma.hbm_to_vmem [thread:$0]  %s1737_s6, 4096, %s46_s21, [#allocation6], %s1564_s16, %s1564_s16, %s1565_s17  }
  0x19   :  { %1557 = dma.done.wait [#allocation3], 8192  }
  0x1a   :  { %1558 = vsyncadd [#allocation3], 4294959104 }
  0x1b   :  { %1559 = dma.done.wait [#allocation6], 4096  }
  0x1c   :  { %1560 = vsyncadd [#allocation6], 4294963200  ;;  %v1567_v0 = vmov 0   ;;  %v1323_v1 = vld [vmem:[%s1733_s2 + $0x4] ss:$16 sps:$4 sm:$0xff]   ;;  %vm112_vm0 = vcmask 130048  }
  0x1d   :  { %148 = vmatprep.mubr.bf16.mxu1 %v1567_v0  ;;  %v1325_v2 = vld [vmem:[%s1733_s2] ss:$16 sps:$4 sm:$0xff]   ;;  %130 = vmatprep.subr.bf16.mxu1 %v1323_v1  ;;  %v1326_v4 = vld [vmem:[%s1733_s2 + $0x8] ss:$16 sps:$4 sm:$0xff]   ;;  %v1328_v5 = vld [vmem:[%s1733_s2 + $0xc] ss:$16 sps:$4 sm:$0xff]  }
  0x1e   :  { %v65_v3 = vld [vmem:[%s1731_s0] sm:$0xf]  ;;  %131 = vmatpush1.bf16.msra.mxu1 %v1325_v2  ;;  %v1329_v6 = vld [vmem:[#allocation2 + $0x74] ss:$8 sps:$4 sm:$0xff]   ;;  %v1331_v7 = vld [vmem:[#allocation2 + $0x70] ss:$8 sps:$4 sm:$0xff]  }
  0x1f   :  { %171 = vmatprep.subr.bf16.mxu1 %v1328_v5  ;;  %602 = vmatprep.subr.bf16.mxu0 %v1329_v6  ;;  %v1332_v8 = vld [vmem:[#allocation2 + $0x64] ss:$8 sps:$4 sm:$0xff]   ;;  %v1334_v9 = vld [vmem:[#allocation2 + $0x60] ss:$8 sps:$4 sm:$0xff]   ;;  %v1335_v10 = vld [vmem:[#allocation2 + $0x54] ss:$8 sps:$4 sm:$0xff]  }
  0x20   :  { %603 = vmatpush1.bf16.msra.mxu0 %v1331_v7  ;;  %v1339_v11 = vld [vmem:[#allocation2 + $0x174] ss:$8 sps:$4 sm:$0xff]   ;;  %v1337_v12 = vld [vmem:[#allocation2 + $0x170] ss:$8 sps:$4 sm:$0xff]   ;;  %v1341_v14 = vld [vmem:[#allocation2 + $0x44] ss:$8 sps:$4 sm:$0xff]   ;;  %v72_v7 = vlaneseq }
  0x21   :  { %1177 = vmatmul.mubr.msk.bf16.vlgmr.msra.gmra.mxu1 %vm112_vm0, %v65_v3  ;;  %604 = vmatprep.subr.bf16.mxu0 %v1332_v8  ;;  %v1340_v13 = vld [vmem:[#allocation2 + $0x50] ss:$8 sps:$4 sm:$0xff]   ;;  %v1345_v15 = vld [vmem:[#allocation2 + $0x164] ss:$8 sps:$4 sm:$0xff]   ;;  %v1346_v16 = vld [vmem:[#allocation2 + $0x40] ss:$8 sps:$4 sm:$0xff]  }
  0x22   :  { %172 = vmatpush1.bf16.msra.mxu1 %v1326_v4  ;;  %189 = vmatprep.mubr.bf16.mxu1 %v1567_v0  ;;  %v1343_v17 = vld [vmem:[#allocation2 + $0x160] ss:$8 sps:$4 sm:$0xff]   ;;  %v1347_v18 = vld [vmem:[#allocation2 + $0x34] ss:$8 sps:$4 sm:$0xff]   ;;  %v1349_v20 = vld [vmem:[#allocation2 + $0x150] ss:$8 sps:$4 sm:$0xff]  }
  0x23   :  { %643 = vmatprep.subr.bf16.mxu1 %v1339_v11  ;;  %v1351_v19 = vld [vmem:[#allocation2 + $0x154] ss:$8 sps:$4 sm:$0xff]   ;;  %v1352_v21 = vld [vmem:[#allocation2 + $0x30] ss:$8 sps:$4 sm:$0xff]   ;;  %v1353_v22 = vld [vmem:[#allocation2 + $0x24] ss:$8 sps:$4 sm:$0xff]  }
  0x24   :  { %605 = vmatpush1.bf16.msra.mxu0 %v1334_v9  ;;  %v1357_v23 = vld [vmem:[#allocation2 + $0x144] ss:$8 sps:$4 sm:$0xff]   ;;  %v1358_v24 = vld [vmem:[#allocation2 + $0x20] ss:$8 sps:$4 sm:$0xff]   ;;  %v1359_v26 = vld [vmem:[#allocation2 + $0x14] ss:$8 sps:$4 sm:$0xff]  }
  0x25   :  { %606 = vmatprep.subr.bf16.mxu0 %v1335_v10  ;;  %v1355_v25 = vld [vmem:[#allocation2 + $0x140] ss:$8 sps:$4 sm:$0xff]   ;;  %v1363_v27 = vld [vmem:[#allocation2 + $0x134] ss:$8 sps:$4 sm:$0xff]   ;;  %v1361_v28 = vld [vmem:[#allocation2 + $0x130] ss:$8 sps:$4 sm:$0xff]  }
  0x26   :  { %v1364_v29 = vld [vmem:[#allocation2 + $0x10] ss:$8 sps:$4 sm:$0xff]   ;;  %v1365_v30 = vld [vmem:[#allocation2 + $0x4] ss:$8 sps:$4 sm:$0xff]   ;;  %v1370_v32 = vld [vmem:[#allocation2] ss:$8 sps:$4 sm:$0xff]  }
  0x27   :  { %v1369_v31 = vld [vmem:[#allocation2 + $0x124] ss:$8 sps:$4 sm:$0xff]   ;;  %v1367_v33 = vld [vmem:[#allocation2 + $0x120] ss:$8 sps:$4 sm:$0xff]   ;;  %v1371_v34 = vld [vmem:[#allocation2 + $0xf4] ss:$8 sps:$4 sm:$0xff]  }
  0x28   :  { %607 = vmatpush1.bf16.msra.mxu0 %v1340_v13  ;;  %v1375_v35 = vld [vmem:[#allocation2 + $0x114] ss:$8 sps:$4 sm:$0xff]   ;;  %v1373_v36 = vld [vmem:[#allocation2 + $0x110] ss:$8 sps:$4 sm:$0xff]   ;;  %v1377_v38 = vld [vmem:[#allocation2 + $0xe4] ss:$8 sps:$4 sm:$0xff]  }
  0x29   :  { %1178 = vmatmul.mubr.msk.bf16.vlgmr.msra.gmra.mxu1 %vm112_vm0, %v65_v3  ;;  %608 = vmatprep.subr.bf16.mxu0 %v1341_v14  ;;  %v1376_v37 = vld [vmem:[#allocation2 + $0xf0] ss:$8 sps:$4 sm:$0xff]   ;;  %v1381_v39 = vld [vmem:[#allocation2 + $0x104] ss:$8 sps:$4 sm:$0xff]   ;;  %v1379_v40 = vld [vmem:[#allocation2 + $0x100] ss:$8 sps:$4 sm:$0xff]  }
  0x2a   :  { %644 = vmatpush1.bf16.msra.mxu1 %v1337_v12  ;;  %v1382_v41 = vld [vmem:[#allocation2 + $0xe0] ss:$8 sps:$4 sm:$0xff]   ;;  %v1383_v42 = vld [vmem:[#allocation2 + $0xd4] ss:$8 sps:$4 sm:$0xff]   ;;  %v1388_v44 = vld [vmem:[#allocation2 + $0xd0] ss:$8 sps:$4 sm:$0xff]  }
  0x2b   :  { %645 = vmatprep.subr.bf16.mxu1 %v1345_v15  ;;  %v1387_v43 = vld [vmem:[#allocation2 + $0x1f4] ss:$8 sps:$4 sm:$0xff]   ;;  %v1385_v45 = vld [vmem:[#allocation2 + $0x1f0] ss:$8 sps:$4 sm:$0xff]   ;;  %v1389_v46 = vld [vmem:[#allocation2 + $0xc4] ss:$8 sps:$4 sm:$0xff]  }
  0x2c   :  { %609 = vmatpush1.bf16.msra.mxu0 %v1346_v16  ;;  %v1393_v47 = vld [vmem:[#allocation2 + $0x1e4] ss:$8 sps:$4 sm:$0xff]   ;;  %v1394_v48 = vld [vmem:[#allocation2 + $0xc0] ss:$8 sps:$4 sm:$0xff]   ;;  %v1395_v50 = vld [vmem:[#allocation2 + $0xb4] ss:$8 sps:$4 sm:$0xff]  }
  0x2d   :  { %610 = vmatprep.subr.bf16.mxu0 %v1347_v18  ;;  %v1391_v49 = vld [vmem:[#allocation2 + $0x1e0] ss:$8 sps:$4 sm:$0xff]   ;;  %v1399_v51 = vld [vmem:[#allocation2 + $0x1d4] ss:$8 sps:$4 sm:$0xff]   ;;  %v1400_v52 = vld [vmem:[#allocation2 + $0xb0] ss:$8 sps:$4 sm:$0xff]  }
  0x2e   :  { %646 = vmatpush1.bf16.msra.mxu1 %v1343_v17  ;;  %v1397_v53 = vld [vmem:[#allocation2 + $0x1d0] ss:$8 sps:$4 sm:$0xff]   ;;  %v1401_v54 = vld [vmem:[#allocation2 + $0xa4] ss:$8 sps:$4 sm:$0xff]   ;;  %v1406_v56 = vld [vmem:[#allocation2 + $0xa0] ss:$8 sps:$4 sm:$0xff]  }
  0x2f   :  { %647 = vmatprep.subr.bf16.mxu1 %v1351_v19  ;;  %v1405_v55 = vld [vmem:[#allocation2 + $0x1c4] ss:$8 sps:$4 sm:$0xff]   ;;  %v1403_v57 = vld [vmem:[#allocation2 + $0x1c0] ss:$8 sps:$4 sm:$0xff]   ;;  %v1407_v58 = vld [vmem:[#allocation2 + $0x94] ss:$8 sps:$4 sm:$0xff]  }
  0x30   :  { %611 = vmatpush1.bf16.msra.mxu0 %v1352_v21  ;;  %v1411_v59 = vld [vmem:[#allocation2 + $0x1b4] ss:$8 sps:$4 sm:$0xff]   ;;  %v1409_v60 = vld [vmem:[#allocation2 + $0x1b0] ss:$8 sps:$4 sm:$0xff]   ;;  %v1413_v62 = vld [vmem:[#allocation2 + $0x84] ss:$8 sps:$4 sm:$0xff]  }
  0x31   :  { %612 = vmatprep.subr.bf16.mxu0 %v1353_v22  ;;  %v1412_v61 = vld [vmem:[#allocation2 + $0x90] ss:$8 sps:$4 sm:$0xff]   ;;  %v1417_v63 = vld [vmem:[#allocation2 + $0x1a4] ss:$8 sps:$4 sm:$0xff]   ;;  %v1415_v0 = vld [vmem:[#allocation2 + $0x1a0] ss:$8 sps:$4 sm:$0xff]  }
  0x32   :  { %648 = vmatpush1.bf16.msra.mxu1 %v1349_v20  ;;  %v1418_v1 = vld [vmem:[#allocation2 + $0x80] ss:$8 sps:$4 sm:$0xff]   ;;  %v1421_v2 = vld [vmem:[#allocation2 + $0x194] ss:$8 sps:$4 sm:$0xff]   ;;  %v1419_v3 = vld [vmem:[#allocation2 + $0x190] ss:$8 sps:$4 sm:$0xff]  }
  0x33   :  { %649 = vmatprep.subr.bf16.mxu1 %v1357_v23  ;;  %v1424_v4 = vld [vmem:[#allocation2 + $0x184] ss:$8 sps:$4 sm:$0xff]   ;;  %v1422_v5 = vld [vmem:[#allocation2 + $0x180] ss:$8 sps:$4 sm:$0xff]   ;;  %v1427_v6 = vld [vmem:[#allocation5 + $0x74] ss:$8 sps:$4 sm:$0xff]  }
  0x34   :  { %613 = vmatpush1.bf16.msra.mxu0 %v1358_v24  ;;  %v73_v8 = vshrl.u32 %v72_v7, 7  ;;  %v70_v10 = vld [vmem:[%s1734_s3] sm:$0xf]  ;;  %v1475_v7 = vld [vmem:[%s1739_s8 + $0x70] sm:$0xff]   ;;  %vm1143_vm1 = vcmask 64512   ;;  %vm1153_vm2 = vcmask 130112  }
  0x35   :  { %614 = vmatprep.subr.bf16.mxu0 %v1359_v26  ;;  %vm1155_vm3 = vcmask 138368  }
  0x36   :  { %650 = vmatpush1.bf16.msra.mxu1 %v1355_v25  ;;  %v1651_v9 = vsub.s32 0, %v73_v8  ;;  %v1656_v11 = vsub.s32 1, %v73_v8  ;;  %v82_v16 = vsub.s32 2, %v73_v8  ;;  %v86_v19 = vsub.s32 3, %v73_v8  ;;  %v1476_v8 = vld [vmem:[%s1739_s8 + $0x30] sm:$0xff]  }
  0x37   :  { %651 = vmatprep.subr.bf16.mxu1 %v1363_v27  ;;  %v1425_v27 = vld [vmem:[#allocation5 + $0x70] ss:$8 sps:$4 sm:$0xff]  }
  0x38   :  { %615 = vmatpush1.bf16.msra.mxu0 %v1364_v29  ;;  %v75_v12 = vrot.slane %v70_v10, %v1651_v9  ;;  %v79_v13 = vrot.slane %v70_v10, %v1656_v11  ;;  %v83_v22 = vrot.slane %v70_v10, %v82_v16  ;;  %v87_v26 = vrot.slane %v70_v10, %v86_v19  ;;  %v1477_v10 = vld [vmem:[%s1739_s8 + $0x68] sm:$0xff]   ;;  %v1482_v16 = vld [vmem:[%s1739_s8 + $0x18] sm:$0xff]   ;;  %v270_v19 = vld [vmem:[%s1736_s5] sm:$0x3] }
  0x39   :  { %616 = vmatprep.subr.bf16.mxu0 %v1365_v30  ;;  %v1430_v30 = vld [vmem:[#allocation5 + $0x64] ss:$8 sps:$4 sm:$0xff]  }
  0x3a   :  { %652 = vmatpush1.bf16.msra.mxu1 %v1361_v28 }
  0x3b   :  { %653 = vmatprep.subr.bf16.mxu1 %v1369_v31 }
  0x3c   :  { %617 = vmatpush1.bf16.msra.mxu0 %v1370_v32 }
  0x3d   :  { %618 = vmatprep.subr.bf16.mxu0 %v1371_v34  ;;  %v1428_v34 = vld [vmem:[#allocation5 + $0x60] ss:$8 sps:$4 sm:$0xff]  }
  0x3e   :  { %654 = vmatpush1.bf16.msra.mxu1 %v1367_v33 }
  0x3f   :  { %655 = vmatprep.subr.bf16.mxu1 %v1375_v35 }
  0x40   :  { %619 = vmatpush2.bf16.msra.mxu0 %v1376_v37  ;;  %v1433_v37 = vld [vmem:[#allocation5 + $0x54] ss:$8 sps:$4 sm:$0xff]  }
  0x41   :  { %620 = vmatprep.subr.bf16.mxu0 %v1377_v38 }
  0x42   :  { %656 = vmatpush1.bf16.msra.mxu1 %v1373_v36 }
  0x43   :  { %657 = vmatprep.subr.bf16.mxu1 %v1381_v39 }
  0x44   :  { %621 = vmatpush2.bf16.msra.mxu0 %v1382_v41  ;;  %v1431_v41 = vld [vmem:[#allocation5 + $0x50] ss:$8 sps:$4 sm:$0xff]  }
  0x45   :  { %622 = vmatprep.subr.bf16.mxu0 %v1383_v42 }
  0x46   :  { %658 = vmatpush1.bf16.msra.mxu1 %v1379_v40 }
  0x47   :  { %659 = vmatprep.subr.bf16.mxu1 %v1387_v43  ;;  %v1436_v43 = vld [vmem:[#allocation5 + $0x44] ss:$8 sps:$4 sm:$0xff]  }
  0x48   :  { %623 = vmatpush2.bf16.msra.mxu0 %v1388_v44  ;;  %v1434_v44 = vld [vmem:[#allocation5 + $0x40] ss:$8 sps:$4 sm:$0xff]  }
  0x49   :  { %624 = vmatprep.subr.bf16.mxu0 %v1389_v46  ;;  %v1437_v46 = vld [vmem:[#allocation5 + $0x30] ss:$8 sps:$4 sm:$0xff]  }
  0x4a   :  { %660 = vmatpush2.bf16.msra.mxu1 %v1385_v45  ;;  %v1439_v45 = vld [vmem:[#allocation5 + $0x34] ss:$8 sps:$4 sm:$0xff]  }
  0x4b   :  { %661 = vmatprep.subr.bf16.mxu1 %v1393_v47  ;;  %v1442_v47 = vld [vmem:[#allocation5 + $0x24] ss:$8 sps:$4 sm:$0xff]  }
  0x4c   :  { %625 = vmatpush2.bf16.msra.mxu0 %v1394_v48  ;;  %v1440_v48 = vld [vmem:[#allocation5 + $0x20] ss:$8 sps:$4 sm:$0xff]  }
  0x4d   :  { %626 = vmatprep.subr.bf16.mxu0 %v1395_v50  ;;  %v1443_v50 = vld [vmem:[#allocation5 + $0x10] ss:$8 sps:$4 sm:$0xff]  }
  0x4e   :  { %662 = vmatpush2.bf16.msra.mxu1 %v1391_v49  ;;  %v1445_v49 = vld [vmem:[#allocation5 + $0x14] ss:$8 sps:$4 sm:$0xff]  }
  0x4f   :  { %663 = vmatprep.subr.bf16.mxu1 %v1399_v51  ;;  %v1448_v51 = vld [vmem:[#allocation5 + $0x4] ss:$8 sps:$4 sm:$0xff]  }
  0x50   :  { %627 = vmatpush2.bf16.msra.mxu0 %v1400_v52  ;;  %v1446_v52 = vld [vmem:[#allocation5] ss:$8 sps:$4 sm:$0xff]  }
  0x51   :  { %628 = vmatprep.subr.bf16.mxu0 %v1401_v54  ;;  %v1449_v54 = vld [vmem:[#allocation5 + $0xf0] ss:$8 sps:$4 sm:$0xff]  }
  0x52   :  { %664 = vmatpush2.bf16.msra.mxu1 %v1397_v53  ;;  %v1451_v53 = vld [vmem:[#allocation5 + $0xf4] ss:$8 sps:$4 sm:$0xff]  }
  0x53   :  { %665 = vmatprep.subr.bf16.mxu1 %v1405_v55  ;;  %v1454_v55 = vld [vmem:[#allocation5 + $0xe4] ss:$8 sps:$4 sm:$0xff]  }
  0x54   :  { %629 = vmatpush2.bf16.msra.mxu0 %v1406_v56  ;;  %v1452_v56 = vld [vmem:[#allocation5 + $0xe0] ss:$8 sps:$4 sm:$0xff]  }
  0x55   :  { %630 = vmatprep.subr.bf16.mxu0 %v1407_v58  ;;  %v1455_v58 = vld [vmem:[#allocation5 + $0xd0] ss:$8 sps:$4 sm:$0xff]  }
  0x56   :  { %666 = vmatpush2.bf16.msra.mxu1 %v1403_v57  ;;  %v1457_v57 = vld [vmem:[#allocation5 + $0xd4] ss:$8 sps:$4 sm:$0xff]  }
  0x57   :  { %667 = vmatprep.subr.bf16.mxu1 %v1411_v59  ;;  %v1460_v59 = vld [vmem:[#allocation5 + $0xc4] ss:$8 sps:$4 sm:$0xff]  }
  0x58   :  { %631 = vmatpush2.bf16.msra.mxu0 %v1412_v61  ;;  %v1463_v61 = vld [vmem:[#allocation5 + $0xb4] ss:$8 sps:$4 sm:$0xff]  }
  0x59   :  { %632 = vmatprep.subr.bf16.mxu0 %v1413_v62  ;;  %v1461_v62 = vld [vmem:[#allocation5 + $0xb0] ss:$8 sps:$4 sm:$0xff]  }
  0x5a   :  { %668 = vmatpush2.bf16.msra.mxu1 %v1409_v60  ;;  %v1458_v60 = vld [vmem:[#allocation5 + $0xc0] ss:$8 sps:$4 sm:$0xff]  }
  0x5b   :  { %669 = vmatprep.subr.bf16.mxu1 %v1417_v63  ;;  %v1466_v63 = vld [vmem:[#allocation5 + $0xa4] ss:$8 sps:$4 sm:$0xff]  }
  0x5c   :  { %633 = vmatpush2.bf16.msra.mxu0 %v1418_v1  ;;  %v1469_v1 = vld [vmem:[#allocation5 + $0x94] ss:$8 sps:$4 sm:$0xff]  }
  0x5d   :  { %892 = vmatprep.subr.bf16.mxu0 %v1427_v6  ;;  %v1474_v6 = vld [vmem:[%s1739_s8 + $0x38] sm:$0xff]  }
  0x5e   :  { %670 = vmatpush2.bf16.msra.mxu1 %v1415_v0  ;;  %v1464_v0 = vld [vmem:[#allocation5 + $0xa0] ss:$8 sps:$4 sm:$0xff]  }
  0x5f   :  { %671 = vmatprep.subr.bf16.mxu1 %v1421_v2  ;;  %v1467_v2 = vld [vmem:[#allocation5 + $0x90] ss:$8 sps:$4 sm:$0xff]  }
  0x62   :  { %672 = vmatpush2.bf16.msra.mxu1 %v1419_v3  ;;  %v1472_v3 = vld [vmem:[#allocation5 + $0x84] ss:$8 sps:$4 sm:$0xff]  }
  0x63   :  { %673 = vmatprep.subr.bf16.mxu1 %v1424_v4  ;;  %v1470_v4 = vld [vmem:[#allocation5 + $0x80] ss:$8 sps:$4 sm:$0xff]  }
  0x66   :  { %674 = vmatpush2.bf16.msra.mxu1 %v1422_v5  ;;  %v1473_v5 = vld [vmem:[%s1739_s8 + $0x78] sm:$0xff]  }
  0x67   :  { %1293 = vmatprep.subr.bf16.mxu1 %v1473_v5 }
  0xe1   :  { %v150_v14 = vpop.f32.mrf.mxu1 }
  0xe2   :  { %v151_v15 = vadd.f32 %v150_v14, %v75_v12  ;;  %v1478_v12 = vld [vmem:[%s1739_s8 + $0x28] sm:$0xff]   ;;  %v1480_v14 = vld [vmem:[%s1739_s8 + $0x20] sm:$0xff]  }
  0xe3   :  { %v152_v17 = vpop.f32.mrf.mxu1 }
  0xe4   :  { %v153_v18 = vadd.f32 %v152_v17, %v79_v13  ;;  %v198_v20 = vmax.f32 %v151_v15, 0.0  ;;  %v1479_v13 = vld [vmem:[%s1739_s8 + $0x60] sm:$0xff]   ;;  %v1481_v15 = vld [vmem:[%s1739_s8 + $0x58] sm:$0xff]   ;;  %v1483_v17 = vld [vmem:[%s1739_s8 + $0x50] sm:$0xff]  }
  0xe5   :  { %v154_v21 = vpop.f32.mrf.mxu1 }
  0xe6   :  { %v199_v23 = vmax.f32 %v153_v18, 0.0  ;;  %v202_v28 = vpack.c.bf16 %v198_v20, %v198_v20  ;;  %v1484_v18 = vld [vmem:[%s1739_s8 + $0x10] sm:$0xff]  }
  0xe7   :  { %v155_v24 = vpop.f32.mrf.mxu1 }
  0xe8   :  { %v203_v25 = vpack.c.bf16 %v199_v23, %v199_v23  ;;  %v279_v24 = vrot.slane %v270_v19, %v1656_v11 }
  0xe9   :  { %v191_v29 = vpop.f32.mrf.mxu1 }
  0xea   :  { %v192_v31 = vadd.f32 %v191_v29, %v83_v22  ;;  %634 = vmatprep.mubr.bf16.mxu0 %v203_v25  ;;  %v275_v22 = vrot.slane %v270_v19, %v1651_v9 }
  0xeb   :  { %v193_v32 = vpop.f32.mrf.mxu1  ;;  %635 = vmatmul.mubr.bf16.vlgmr.msra.gmra.mxu0 %v202_v28 }
  0xec   :  { %v194_v33 = vadd.f32 %v193_v32, %v87_v26  ;;  %893 = vmatpush1.bf16.msra.mxu0 %v1425_v27  ;;  %v200_v35 = vmax.f32 %v192_v31, 0.0 }
  0xed   :  { %v195_v36 = vpop.f32.mrf.mxu1  ;;  %894 = vmatprep.subr.bf16.mxu0 %v1430_v30 }
  0xee   :  { %v201_v38 = vmax.f32 %v194_v33, 0.0  ;;  %v204_v42 = vpack.c.bf16 %v200_v35, %v200_v35 }
  0xef   :  { %v196_v39 = vpop.f32.mrf.mxu1 }
  0xf0   :  { %v205_v40 = vpack.c.bf16 %v201_v38, %v201_v38  ;;  %895 = vmatpush1.bf16.msra.mxu0 %v1428_v34  ;;  %v1485_v38 = vld [vmem:[%s1739_s8 + $0x48] sm:$0xff]  }
  0xf1   :  { %896 = vmatprep.subr.bf16.mxu0 %v1433_v37  ;;  %v1486_v39 = vld [vmem:[%s1739_s8 + $0x8] sm:$0xff]  }
  0xf2   :  { %675 = vmatprep.mubr.bf16.mxu1 %v205_v40  ;;  %v1487_v40 = vld [vmem:[%s1739_s8 + $0x40] sm:$0xff]  }
  0xf3   :  { %676 = vmatmul.mubr.bf16.vlgmr.msra.gmra.mxu1 %v204_v42  ;;  %v1116_v42 = vld [vmem:[%s1732_s1] sm:$0xff] }
  0xf4   :  { %897 = vmatpush1.bf16.msra.mxu0 %v1431_v41  ;;  %1294 = vmatpush3.bf16.msra.mxu1 %v1474_v6  ;;  %v1488_v41 = vld [vmem:[%s1739_s8] sm:$0xff]  }
  0xf5   :  { %898 = vmatprep.subr.bf16.mxu0 %v1436_v43  ;;  %1295 = vmatprep.subr.bf16.mxu1 %v1475_v7  ;;  %v720_v43 = vld [vmem:[%s1738_s7] sm:$0x3]  ;;  %s1568_s7 = smov 120  }
  0xf6   :  { %1118 = vrot.lane.b32.xlu0 %v1116_v42, %s1565_s17 }
  0xf8   :  { %899 = vmatpush1.bf16.msra.mxu0 %v1434_v44  ;;  %1296 = vmatpush3.bf16.msra.mxu1 %v1476_v8  ;;  %v725_v44 = vrot.slane %v720_v43, %v1651_v9 }
  0xf9   :  { %900 = vmatprep.subr.bf16.mxu0 %v1439_v45  ;;  %1297 = vmatprep.subr.bf16.mxu1 %v1477_v10  ;;  %v729_v45 = vrot.slane %v720_v43, %v1656_v11 }
  0xfc   :  { %901 = vmatpush1.bf16.msra.mxu0 %v1437_v46  ;;  %1298 = vmatpush3.bf16.msra.mxu1 %v1478_v12 }
  0xfd   :  { %902 = vmatprep.subr.bf16.mxu0 %v1442_v47  ;;  %1299 = vmatprep.subr.bf16.mxu1 %v1479_v13 }
 0x100   :  { %903 = vmatpush1.bf16.msra.mxu0 %v1440_v48  ;;  %1300 = vmatpush3.bf16.msra.mxu1 %v1480_v14  ;;  %v1129_v14 = vmul.f32 -0.5, %v1116_v42 }
 0x101   :  { %904 = vmatprep.subr.bf16.mxu0 %v1445_v49  ;;  %1301 = vmatprep.subr.bf16.mxu1 %v1481_v15 }
 0x102   :  { %v1130_v15 = vmul.f32 %v1129_v14, %v1116_v42 }
 0x104   :  { %905 = vmatpush1.bf16.msra.mxu0 %v1443_v50  ;;  %1302 = vmatpush3.bf16.msra.mxu1 %v1482_v16 }
 0x105   :  { %906 = vmatprep.subr.bf16.mxu0 %v1448_v51  ;;  %1303 = vmatprep.subr.bf16.mxu1 %v1483_v17 }
 0x108   :  { %907 = vmatpush1.bf16.msra.mxu0 %v1446_v52  ;;  %1304 = vmatpush3.bf16.msra.mxu1 %v1484_v18 }
 0x109   :  { %908 = vmatprep.subr.bf16.mxu0 %v1451_v53  ;;  %1305 = vmatprep.subr.bf16.mxu1 %v1485_v38 }
 0x10c   :  { %909 = vmatpush2.bf16.msra.mxu0 %v1449_v54  ;;  %1306 = vmatpush3.bf16.msra.mxu1 %v1486_v39 }
 0x10d   :  { %910 = vmatprep.subr.bf16.mxu0 %v1454_v55  ;;  %1307 = vmatprep.subr.bf16.mxu1 %v1487_v40 }
 0x110   :  { %911 = vmatpush2.bf16.msra.mxu0 %v1452_v56  ;;  %1308 = vmatpush3.bf16.msra.mxu1 %v1488_v41 }
 0x111   :  { %912 = vmatprep.subr.bf16.mxu0 %v1457_v57  ;;  %v1275_v57 = vld [vmem:[%s1740_s9] ss:$0 sm:$0xff]  ;;  %s1570_s9 = smov [#allocation7]  }
 0x114   :  { %913 = vmatpush2.bf16.msra.mxu0 %v1455_v58 }
 0x115   :  { %914 = vmatprep.subr.bf16.mxu0 %v1460_v59 }
 0x118   :  { %915 = vmatpush2.bf16.msra.mxu0 %v1458_v60 }
 0x119   :  { %916 = vmatprep.subr.bf16.mxu0 %v1463_v61 }
 0x11c   :  { %917 = vmatpush2.bf16.msra.mxu0 %v1461_v62 }
 0x11d   :  { %918 = vmatprep.subr.bf16.mxu0 %v1466_v63 }
 0x120   :  { %919 = vmatpush2.bf16.msra.mxu0 %v1464_v0 }
 0x121   :  { %920 = vmatprep.subr.bf16.mxu0 %v1469_v1 }
 0x124   :  { %921 = vmatpush2.bf16.msra.mxu0 %v1467_v2 }
 0x125   :  { %922 = vmatprep.subr.bf16.mxu0 %v1472_v3  ;;  %v1569_v3 = vmov 0.0  }
 0x126   :  { %1147 = vst [vmem:[#allocation7] sm:$0xff] %v1569_v3 }
 0x128   :  { %923 = vmatpush2.bf16.msra.mxu0 %v1470_v4 }
 0x168   :  { %v1119_v0 = vpop.permute.xlu0 %1118 }
 0x1ab   :  { %v636_v20 = vpop.f32.mrf.mxu0 }
 0x1ac   :  { %v637_v26 = vadd.f32 %v636_v20, %v275_v22 }
 0x1ad   :  { %v638_v21 = vpop.f32.mrf.mxu0 }
 0x1ae   :  { %v639_v28 = vadd.f32 %v638_v21, %v279_v24 }
 0x1af   :  { %v640_v23 = vpop.f32.mrf.mxu0 }
 0x1b1   :  { %v641_v25 = vpop.f32.mrf.mxu0 }
 0x1b3   :  { %v677_v27 = vpop.f32.mrf.mxu1 }
 0x1b4   :  { %v678_v29 = vadd.f32 %v677_v27, %v637_v26 }
 0x1b5   :  { %v679_v30 = vpop.f32.mrf.mxu1 }
 0x1b6   :  { %v680_v31 = vadd.f32 %v679_v30, %v639_v28  ;;  %v684_v32 = vmax.f32 %v678_v29, 0.0 }
 0x1b7   :  { %v681_v33 = vpop.f32.mrf.mxu1 }
 0x1b8   :  { %v685_v34 = vmax.f32 %v680_v31, 0.0  ;;  %v686_v37 = vpack.c.bf16 %v684_v32, %v684_v32 }
 0x1b9   :  { %v682_v35 = vpop.f32.mrf.mxu1 }
 0x1ba   :  { %v687_v36 = vpack.c.bf16 %v685_v34, %v685_v34 }
 0x1bc   :  { %924 = vmatprep.mubr.bf16.mxu0 %v687_v36 }
 0x1bd   :  { %925 = vmatmul.mubr.bf16.vlgmr.msra.gmra.mxu0 %v686_v37 }
 0x27d   :  { %v926_v46 = vpop.f32.mrf.mxu0 }
 0x27e   :  { %v927_v47 = vadd.f32 %v926_v46, %v725_v44 }
 0x27f   :  { %v928_v48 = vpop.f32.mrf.mxu0 }
 0x280   :  { %v929_v49 = vadd.f32 %v928_v48, %v729_v45  ;;  %v933_v50 = vmax.f32 %v927_v47, 0.0 }
 0x281   :  { %v930_v51 = vpop.f32.mrf.mxu0 }
 0x282   :  { %v934_v52 = vmax.f32 %v929_v49, 0.0  ;;  %v935_v55 = vpack.c.bf16 %v933_v50, %v933_v50 }
 0x283   :  { %v931_v53 = vpop.f32.mrf.mxu0 }
 0x284   :  { %v936_v54 = vpack.c.bf16 %v934_v52, %v934_v52 }
 0x286   :  { %1104 = vmatprep.mubr.bf16.mxu1 %v936_v54 }
 0x287   :  { %1105 = vmatmul.mubr.bf16.vlgmr.msra.gmra.mxu1 %v935_v55 }
 0x347   :  { %v1309_v56 = vpop.f32.mrf.mxu1 }
 0x349   :  { %v1310_v9 = vpop.f32.mrf.mxu1 }
 0x34a   :  { %v1311_v58 = vadd.f32 %v1310_v9, %v1309_v56 }
 0x34b   :  { %v1312_v11 = vpop.f32.mrf.mxu1 }
 0x34c   :  { %v1107_v59 = vadd.f32 %v1311_v58, %v1275_v57 }
 0x34d   :  { %v1313_v60 = vpop.f32.mrf.mxu1 }
 0x34e   :  { %v1112_v61 = vmax.f32 %v1107_v59, -20.0 }
 0x350   :  { %v1113_v62 = vmin.f32 %v1112_v61, 2.0 }
 0x352   :  { %1132 = vrot.lane.b32.xlu1 %v1113_v62, %s1568_s7  ;;  %v1114_v63 = vmul.f32 1.442695, %v1113_v62 }
 0x354   :  { %1489 = vpow2.f32 %v1114_v63 }
 0x355   :  { %1491 = vtanh.f32 %v1107_v59 }
 0x361   :  { %v1490_v1 = vpop.eup %1489 }
 0x362   :  { %v1121_v2 = vmul.f32 %v1490_v1, %v1119_v0  ;;  %v1492_v4 = vpop.eup %1491 }
 0x364   :  { %1123 = vrot.lane.b32.xlu0 %v1121_v2, %s1568_s7 }
 0x368   :  { %1150 = vrot.lane.b32.xlu0 %v1492_v4, %s1565_s17  ;;  %s1163_s17 = sshll.u32 %s1570_s9, 4  ;;  %s1164_s17 = int_to_ptr.vmem [resolvable:$true] %s1163_s17 }
 0x369   :  { %s1537_s25 = scalar_lea.vmem %s1164_s17, 128  ;;  %p1542_p11 = scmp.lt.s32.totalorder %s1164_s17, %s1164_s17 }
 0x36a   :  { %p1538_p10 = scmp.ne.s32.totalorder %s1164_s17, %s1537_s25  ;;  %p1543_p12 = scmp.lt.s32.totalorder %s1537_s25, %s1537_s25 }
 0x36c   :  { %p1544_p13 = por %p1543_p12, %p1542_p11 }
 0x36e   :  { %p1545_p0 = pnand %p1544_p13, %p1538_p10 }
 0x3c4   :  { %v1133_v16 = vpop.permute.xlu1 %1132 }
 0x3c5   :  { %v1135_v17 = vsub.f32 %v1130_v15, %v1133_v16 }
 0x3c7   :  { %v1292_v19 = vadd.f32 -0.9189385, %v1135_v17 }
 0x3d6   :  { %v1124_v5 = vpop.permute.xlu0 %1123 }
 0x3d7   :  { %v1126_v6 = vadd.f32 %v1124_v5, %v1107_v59 }
 0x3d9   :  { %1493 = vtanh.f32 %v1126_v6 }
 0x3da   :  { %v1151_v8 = vpop.permute.xlu0 %1150 }
 0x3e6   :  { %v1494_v7 = vpop.eup %1493 }
 0x3e7   :  { %v1137_v10 = vmul.f32 %v1494_v7, %v1494_v7  ;;  %1148 = vst.msk [vmem:[#allocation7] sm:$0xff] %vm1143_vm1, %v1494_v7 }
 0x3e8   :  { %1154 = vst.msk [vmem:[#allocation7] sm:$0xff] %vm1153_vm2, %v1151_v8 }
 0x3e9   :  { %v1138_v12 = vsub.f32 1.0, %v1137_v10 }
 0x3eb   :  { %v1139_v13 = vadd.f32 1e-06, %v1138_v12 }
 0x3ed   :  { %1495 = vlog2.f32 %v1139_v13 }
 0x3fa   :  { %v1496_v18 = vpop.eup %1495 }
 0x3fb   :  { %v1141_v20 = vmul.f32 0.6931472, %v1496_v18 }
 0x3fd   :  { %v1142_v21 = vsub.f32 %v1292_v19, %v1141_v20 }
 0x3ff   :  { %v1144_v22 = vsel %vm1143_vm1, %v1142_v21, 0.0 }
 0x400   :  { %1145 = vadd.xlane.f32.xlu1 %v1144_v22 }
 0x489   :  { %v1146_v23 = vpop.xlane.xlu1 %1145 }
 0x48a   :  { %1156 = vst.msk [vmem:[#allocation7] sm:$0xff] %vm1155_vm3, %v1146_v23 }
 0x48b   :  { %1548 = shalt.err (!%p1545_p0)
}
 0x48c   :  { %1166 = dma.vmem_to_hbm [thread:$0]  %s1164_s17, 128, %s1741_s10, [#allocation4]  }
 0x48d   :  { %1561 = dma.done.wait [#allocation4], 128  }
 0x48e   :  { %1562 = vsyncadd [#allocation4], 4294967168 }
 0x48f   :  { %1170 = vsyncpa [#allocation3], 1 }
 0x490   :  { %1171 = vsyncpa [#allocation6], 1 }
 0x491   :  { %1172 = vsyncpa [#allocation4], 1 }

</bundles_post_ra>
